<compile_context>
chip_gen: v5e
topology: v5e:2x2
jax: 0.10.0
libtpu: 0.0.40
codegen_flags: <defaults>
</compile_context>

<pallas_src>
import functools

import jax
import jax.numpy as jnp
from jax.experimental import pallas as pl
from jax.experimental.pallas import tpu as pltpu

LANE = 128


def _round_up(n, m):
    return ((n + m - 1) // m) * m


def _pad_to(a, shape):
    return jnp.pad(a, [(0, t - s) for s, t in zip(a.shape, shape)])


def mlp_kernel(x_ref, w1_ref, b1_ref, w2_ref, b2_ref, w3_ref, b3_ref, o_ref):
    # Cast x to the weight storage dtype inside the kernel (free vs. an HLO
    # convert + extra HBM copy in the wrapper).
    x = x_ref[...].astype(w1_ref.dtype)
    # layer1 + ReLU (f32 MXU accumulation, f32 elementwise)
    h1 = jnp.dot(x, w1_ref[...], preferred_element_type=jnp.float32)
    h1 = jnp.maximum(h1 + b1_ref[...], 0.0).astype(w2_ref.dtype)
    # layer2 + ReLU
    h2 = jnp.dot(h1, w2_ref[...], preferred_element_type=jnp.float32)
    h2 = jnp.maximum(h2 + b2_ref[...], 0.0).astype(w3_ref.dtype)
    # layer3 (no activation)
    out = jnp.dot(h2, w3_ref[...], preferred_element_type=jnp.float32) + b3_ref[...]
    o_ref[...] = out.astype(o_ref.dtype)


def prepare_params(w1, b1, w2, b2, w3, b3, compute_dtype=jnp.float32):
    """Pad (lane-dense N dims) and cast params ONCE, outside the hot path.

    Weights are stored as (in_features, out_features) so y = x @ W + b
    (== nn.Linear's x @ W_torch.T + b with W = W_torch.T).  The K dim of
    layer1 is kept at the real input_size; padded N/K lanes are zero, so they
    cannot perturb the real outputs.
    """
    in_f, hid = w1.shape
    out_f = w3.shape[1]
    hid_p = _round_up(hid, LANE)
    out_p = _round_up(out_f, LANE)
    w1p = _pad_to(jnp.asarray(w1), (in_f, hid_p)).astype(compute_dtype)
    w2p = _pad_to(jnp.asarray(w2), (hid_p, hid_p)).astype(compute_dtype)
    w3p = _pad_to(jnp.asarray(w3), (hid_p, out_p)).astype(compute_dtype)
    # Biases stay f32 (bias-add / ReLU run in f32 vregs).
    b1p = _pad_to(jnp.asarray(b1).reshape(1, -1), (1, hid_p)).astype(jnp.float32)
    b2p = _pad_to(jnp.asarray(b2).reshape(1, -1), (1, hid_p)).astype(jnp.float32)
    b3p = _pad_to(jnp.asarray(b3).reshape(1, -1), (1, out_p)).astype(jnp.float32)
    return w1p, b1p, w2p, b2p, w3p, b3p


@functools.partial(jax.jit, static_argnames=("out_features", "block_rows"))
def _mlp_forward(x, w1p, b1p, w2p, b2p, w3p, b3p, *, out_features,
                 block_rows=1024):
    batch, in_f = x.shape
    hid_p = w1p.shape[1]
    out_p = w3p.shape[1]
    compute_dtype = w1p.dtype
    is_bf16 = jnp.dtype(compute_dtype) == jnp.dtype(jnp.bfloat16)
    sublane = 16 if is_bf16 else 8

    # Batch tile: as large as block_rows, but capped at ceil(batch/2) so large
    # batches keep >=2 grid steps (v7x 2-TC sharding + DMA/compute overlap).
    half = -(-batch // 2)
    tm = _round_up(max(min(block_rows, half), sublane), sublane)
    b_p = _round_up(batch, tm)
    if b_p != batch:  # only pad batch rows when actually needed
        x = jnp.pad(x, ((0, b_p - batch), (0, 0)))

    resident = lambda i: (0, 0)  # weights/biases stay VMEM-resident

    itemsize = jnp.dtype(compute_dtype).itemsize
    flops = 2 * b_p * (in_f * hid_p + hid_p * hid_p + hid_p * out_p)
    bytes_accessed = (
        b_p * in_f * x.dtype.itemsize            # x read
        + b_p * out_p * itemsize                 # output write
        + (w1p.size + w2p.size + w3p.size) * itemsize
        + (b1p.size + b2p.size + b3p.size) * 4
    )

    out_padded = pl.pallas_call(
        mlp_kernel,
        out_shape=jax.ShapeDtypeStruct((b_p, out_p), compute_dtype),
        grid_spec=pltpu.PrefetchScalarGridSpec(
            num_scalar_prefetch=0,
            grid=(b_p // tm,),
            in_specs=[
                pl.BlockSpec((tm, in_f), lambda i: (i, 0)),   # x, real K width
                pl.BlockSpec((in_f, hid_p), resident),        # w1
                pl.BlockSpec((1, hid_p), resident),           # b1
                pl.BlockSpec((hid_p, hid_p), resident),       # w2
                pl.BlockSpec((1, hid_p), resident),           # b2
                pl.BlockSpec((hid_p, out_p), resident),       # w3
                pl.BlockSpec((1, out_p), resident),           # b3
            ],
            out_specs=pl.BlockSpec((tm, out_p), lambda i: (i, 0)),
        ),
        compiler_params=pltpu.CompilerParams(
            dimension_semantics=("parallel",)),
        cost_estimate=pl.CostEstimate(
            flops=flops, transcendentals=0, bytes_accessed=bytes_accessed),
    )(x, w1p, b1p, w2p, b2p, w3p, b3p)

    return out_padded[:batch, :out_features]


def mlp_forward(x, padded_params, out_features, block_rows=1024):
    """Forward pass using params already padded/cast by prepare_params()."""
    return _mlp_forward(x, *padded_params, out_features=out_features,
                        block_rows=block_rows)


def init_params(key, input_size, hidden_size, output_size):
    """Deterministic synthetic init (uniform, like nn.Linear's default)."""
    ks = jax.random.split(key, 6)

    def linear(kw, kb, fan_in, fan_out):
        bound = 1.0 / (fan_in ** 0.5)
        w = jax.random.uniform(kw, (fan_in, fan_out), jnp.float32, -bound, bound)
        b = jax.random.uniform(kb, (1, fan_out), jnp.float32, -bound, bound)
        return w, b

    w1, b1 = linear(ks[0], ks[1], input_size, hidden_size)
    w2, b2 = linear(ks[2], ks[3], hidden_size, hidden_size)
    w3, b3 = linear(ks[4], ks[5], hidden_size, output_size)
    return w1, b1, w2, b2, w3, b3


# TODO(synk): logging / dimension validation / parameter counting from the
# PyTorch module are host-side utilities, not kernel work; omitted.

if __name__ == "__main__":
    input_size, hidden_size, output_size = 32, 64, 16
    batch = 8

    key = jax.random.PRNGKey(0)
    k_x, k_p = jax.random.split(key)
    x = jax.random.normal(k_x, (batch, input_size), jnp.float32)
    w1, b1, w2, b2, w3, b3 = init_params(k_p, input_size, hidden_size, output_size)

    # --- f32 path (exact PyTorch semantics), tiny batch, grid=1 ---
    params_f32 = prepare_params(w1, b1, w2, b2, w3, b3, jnp.float32)
    out = jax.block_until_ready(mlp_forward(x, params_f32, output_size))
    ref = jnp.maximum(x @ w1 + b1, 0.0)
    ref = jnp.maximum(ref @ w2 + b2, 0.0)
    ref = ref @ w3 + b3
    assert out.shape == (batch, output_size)
    assert jnp.allclose(out, ref, atol=1e-5, rtol=1e-5)

    # --- bf16 storage path (v6e/v7x recommendation), 2-step batch grid ---
    batch_big = 512
    x_big = jax.random.normal(jax.random.PRNGKey(1), (batch_big, input_size),
                              jnp.float32)
    params_bf16 = prepare_params(w1, b1, w2, b2, w3, b3, jnp.bfloat16)
    out_bf16 = jax.block_until_ready(
        mlp_forward(x_big, params_bf16, output_size, block_rows=1024))
    assert out_bf16.shape == (batch_big, output_size)
    assert out_bf16.dtype == jnp.bfloat16

    # Reference with the same bf16 storage / f32 accumulation semantics.
    def ref_bf16(xv):
        xv = xv.astype(jnp.bfloat16)
        h = jnp.maximum(
            jnp.dot(xv, w1.astype(jnp.bfloat16),
                    preferred_element_type=jnp.float32) + b1, 0.0
        ).astype(jnp.bfloat16)
        h = jnp.maximum(
            jnp.dot(h, w2.astype(jnp.bfloat16),
                    preferred_element_type=jnp.float32) + b2, 0.0
        ).astype(jnp.bfloat16)
        return jnp.dot(h, w3.astype(jnp.bfloat16),
                       preferred_element_type=jnp.float32) + b3

    ref_big = ref_bf16(x_big)
    assert jnp.allclose(out_bf16.astype(jnp.float32), ref_big,
                        atol=2e-2, rtol=2e-2)

    print("KERNEL_OK")
</pallas_src>

<mosaic_0001>
module attributes {stable_mosaic.version = 11 : i64} {
  func.func @mlp_kernel(%arg0: i32, %arg1: memref<8x32xf32, #tpu.memory_space<vmem>>, %arg2: memref<32x128xf32, #tpu.memory_space<vmem>>, %arg3: memref<1x128xf32, #tpu.memory_space<vmem>>, %arg4: memref<128x128xf32, #tpu.memory_space<vmem>>, %arg5: memref<1x128xf32, #tpu.memory_space<vmem>>, %arg6: memref<128x128xf32, #tpu.memory_space<vmem>>, %arg7: memref<1x128xf32, #tpu.memory_space<vmem>>, %arg8: memref<8x128xf32, #tpu.memory_space<vmem>>) attributes {dimension_semantics = [#tpu.dimension_semantics<parallel>], iteration_bounds = array<i64: 1>, scalar_prefetch = 0 : i64, scratch_operands = 0 : i64, tpu.core_type = #tpu.core_type<tc>, window_params = [{transform_indices = @transform_0, window_bounds = array<i64: 8, 32>}, {pipeline_mode = #tpu.pipeline_mode<synchronous>, transform_indices = @transform_1, window_bounds = array<i64: 32, 128>}, {pipeline_mode = #tpu.pipeline_mode<synchronous>, transform_indices = @transform_2, window_bounds = array<i64: 1, 128>}, {pipeline_mode = #tpu.pipeline_mode<synchronous>, transform_indices = @transform_3, window_bounds = array<i64: 128, 128>}, {pipeline_mode = #tpu.pipeline_mode<synchronous>, transform_indices = @transform_4, window_bounds = array<i64: 1, 128>}, {pipeline_mode = #tpu.pipeline_mode<synchronous>, transform_indices = @transform_5, window_bounds = array<i64: 128, 128>}, {pipeline_mode = #tpu.pipeline_mode<synchronous>, transform_indices = @transform_6, window_bounds = array<i64: 1, 128>}, {transform_indices = @transform_7, window_bounds = array<i64: 8, 128>}]} {
    %c0 = arith.constant 0 : index
    %c0_0 = arith.constant 0 : index
    %0 = vector.load %arg1[%c0, %c0_0] : memref<8x32xf32, #tpu.memory_space<vmem>>, vector<8x32xf32>
    %c0_1 = arith.constant 0 : index
    %c0_2 = arith.constant 0 : index
    %1 = vector.load %arg2[%c0_1, %c0_2] : memref<32x128xf32, #tpu.memory_space<vmem>>, vector<32x128xf32>
    %cst = arith.constant dense<0.000000e+00> : vector<8x128xf32>
    %2 = tpu.matmul %0, %1, %cst {dimension_numbers = #tpu.dot_dimension_numbers<[1], [0], [0], [1], [0, 0, 1, 1], [], []>} : vector<8x32xf32>, vector<32x128xf32>, vector<8x128xf32> -> vector<8x128xf32>
    %c0_3 = arith.constant 0 : index
    %c0_4 = arith.constant 0 : index
    %3 = vector.load %arg3[%c0_3, %c0_4] : memref<1x128xf32, #tpu.memory_space<vmem>>, vector<1x128xf32>
    %4 = vector.broadcast %3 : vector<1x128xf32> to vector<8x128xf32>
    %5 = arith.addf %2, %4 : vector<8x128xf32>
    %cst_5 = arith.constant 0.000000e+00 : f32
    %6 = vector.broadcast %cst_5 : f32 to vector<8x128xf32>
    %7 = arith.maximumf %5, %6 : vector<8x128xf32>
    %c0_6 = arith.constant 0 : index
    %c0_7 = arith.constant 0 : index
    %8 = vector.load %arg4[%c0_6, %c0_7] : memref<128x128xf32, #tpu.memory_space<vmem>>, vector<128x128xf32>
    %cst_8 = arith.constant dense<0.000000e+00> : vector<8x128xf32>
    %9 = tpu.matmul %7, %8, %cst_8 {dimension_numbers = #tpu.dot_dimension_numbers<[1], [0], [0], [1], [0, 0, 1, 1], [], []>} : vector<8x128xf32>, vector<128x128xf32>, vector<8x128xf32> -> vector<8x128xf32>
    %c0_9 = arith.constant 0 : index
    %c0_10 = arith.constant 0 : index
    %10 = vector.load %arg5[%c0_9, %c0_10] : memref<1x128xf32, #tpu.memory_space<vmem>>, vector<1x128xf32>
    %11 = vector.broadcast %10 : vector<1x128xf32> to vector<8x128xf32>
    %12 = arith.addf %9, %11 : vector<8x128xf32>
    %cst_11 = arith.constant 0.000000e+00 : f32
    %13 = vector.broadcast %cst_11 : f32 to vector<8x128xf32>
    %14 = arith.maximumf %12, %13 : vector<8x128xf32>
    %c0_12 = arith.constant 0 : index
    %c0_13 = arith.constant 0 : index
    %15 = vector.load %arg6[%c0_12, %c0_13] : memref<128x128xf32, #tpu.memory_space<vmem>>, vector<128x128xf32>
    %cst_14 = arith.constant dense<0.000000e+00> : vector<8x128xf32>
    %16 = tpu.matmul %14, %15, %cst_14 {dimension_numbers = #tpu.dot_dimension_numbers<[1], [0], [0], [1], [0, 0, 1, 1], [], []>} : vector<8x128xf32>, vector<128x128xf32>, vector<8x128xf32> -> vector<8x128xf32>
    %c0_15 = arith.constant 0 : index
    %c0_16 = arith.constant 0 : index
    %17 = vector.load %arg7[%c0_15, %c0_16] : memref<1x128xf32, #tpu.memory_space<vmem>>, vector<1x128xf32>
    %18 = vector.broadcast %17 : vector<1x128xf32> to vector<8x128xf32>
    %19 = arith.addf %16, %18 : vector<8x128xf32>
    %c0_17 = arith.constant 0 : index
    %c0_18 = arith.constant 0 : index
    %20 = vector.load %arg8[%c0_17, %c0_18] : memref<8x128xf32, #tpu.memory_space<vmem>>, vector<8x128xf32>
    tpu.vector_store %arg8[%c0_17, %c0_18], %19 {strides = array<i32>} : memref<8x128xf32, #tpu.memory_space<vmem>>, vector<8x128xf32>,
    return
  }
  func.func @transform_0(%arg0: i32) -> (i32, i32) {
    %c0_i32 = arith.constant 0 : i32
    %c0_i32_0 = arith.constant 0 : i32
    return %arg0, %c0_i32 : i32, i32
  }
  func.func @transform_1(%arg0: i32) -> (i32, i32) {
    %c0_i32 = arith.constant 0 : i32
    %c0_i32_0 = arith.constant 0 : i32
    %c0_i32_1 = arith.constant 0 : i32
    return %c0_i32, %c0_i32_0 : i32, i32
  }
  func.func @transform_2(%arg0: i32) -> (i32, i32) {
    %c0_i32 = arith.constant 0 : i32
    %c0_i32_0 = arith.constant 0 : i32
    %c0_i32_1 = arith.constant 0 : i32
    return %c0_i32, %c0_i32_0 : i32, i32
  }
  func.func @transform_3(%arg0: i32) -> (i32, i32) {
    %c0_i32 = arith.constant 0 : i32
    %c0_i32_0 = arith.constant 0 : i32
    %c0_i32_1 = arith.constant 0 : i32
    return %c0_i32, %c0_i32_0 : i32, i32
  }
  func.func @transform_4(%arg0: i32) -> (i32, i32) {
    %c0_i32 = arith.constant 0 : i32
    %c0_i32_0 = arith.constant 0 : i32
    %c0_i32_1 = arith.constant 0 : i32
    return %c0_i32, %c0_i32_0 : i32, i32
  }
  func.func @transform_5(%arg0: i32) -> (i32, i32) {
    %c0_i32 = arith.constant 0 : i32
    %c0_i32_0 = arith.constant 0 : i32
    %c0_i32_1 = arith.constant 0 : i32
    return %c0_i32, %c0_i32_0 : i32, i32
  }
  func.func @transform_6(%arg0: i32) -> (i32, i32) {
    %c0_i32 = arith.constant 0 : i32
    %c0_i32_0 = arith.constant 0 : i32
    %c0_i32_1 = arith.constant 0 : i32
    return %c0_i32, %c0_i32_0 : i32, i32
  }
  func.func @transform_7(%arg0: i32) -> (i32, i32) {
    %c0_i32 = arith.constant 0 : i32
    %c0_i32_0 = arith.constant 0 : i32
    return %arg0, %c0_i32 : i32, i32
  }
}

</mosaic_0001>

<bundles_post_ra>
// kernel: _mlp_forward.1
= control target key start
LH: loop header
LB: loop body
LE: loop exit
PB: predicated region body
PF: predicated region fallthrough
CT: control target
= control target key end

     0   :  { %12 = vsyncpa [#allocation3], 0  ;;  %s433_s0 = inlined_call_operand.hbm [shape: f32[8,32], index: 0, kind: input, shape index: {}]   ;;  %s434_s1 = inlined_call_operand.hbm [shape: f32[32,128], index: 1, kind: input, shape index: {}]   ;;  %s435_s2 = inlined_call_operand.vmem [shape: f32[1,128], index: 2, kind: input, shape index: {}]   ;;  %s436_s3 = inlined_call_operand.hbm [shape: f32[128,128], index: 3, kind: input, shape index: {}]   ;;  %s437_s4 = inlined_call_operand.vmem [shape: f32[1,128], index: 4, kind: input, shape index: {}]   ;;  %s438_s5 = inlined_call_operand.hbm [shape: f32[128,128], index: 5, kind: input, shape index: {}]   ;;  %s439_s6 = inlined_call_operand.vmem [shape: f32[1,128], index: 6, kind: input, shape index: {}]   ;;  %s440_s7 = inlined_call_operand.hbm [shape: f32[8,128], index: 7, kind: output, shape index: {}]  }
   0x1   :  { %13 = vsyncpa [#allocation6], 0 }
   0x2   :  { %14 = vsyncpa [#allocation9], 0  ;;  %s31_s26 = sshll.u32 %s434_s1, 4  ;;  %s32_s26 = int_to_ptr.hbm [resolvable:$true] %s31_s26 }
   0x3   :  { %15 = vsyncpa [#allocation4], 0  ;;  %s362_s27 = smov [#allocation5]   ;;  %s21_s8 = sshll.u32 %s433_s0, 4  ;;  %s22_s8 = int_to_ptr.hbm [resolvable:$true] %s21_s8 }
   0x4   :  { %s33_s28 = sshll.u32 %s362_s27, 4  ;;  %s363_s9 = smov 128   ;;  %s34_s28 = int_to_ptr.vmem [resolvable:$true] %s33_s28 }
   0x5   :  { %s364_s10 = smov 8   ;;  %s365_s11 = smov [#allocation2]  }
   0x6   :  { %39 = dma.hbm_to_vmem [thread:$0]  %s32_s26, 512, %s34_s28, [#allocation6], %s363_s9, %s363_s9, %s364_s10  }
   0x7   :  { %s23_s12 = sshll.u32 %s365_s11, 4  ;;  %s46_s15 = sshll.u32 %s436_s3, 4  ;;  %s24_s12 = int_to_ptr.vmem [resolvable:$true] %s23_s12  ;;  %s47_s15 = int_to_ptr.hbm [resolvable:$true] %s46_s15 }
   0x8   :  { %26 = dma.hbm_to_vmem [thread:$0]  %s22_s8, 128, %s24_s12, [#allocation3]  }
   0x9   :  { %s61_s17 = sshll.u32 %s438_s5, 4  ;;  %s366_s18 = smov [#allocation7]   ;;  %s62_s17 = int_to_ptr.hbm [resolvable:$true] %s61_s17 }
   0xa   :  { %s48_s19 = sshll.u32 %s366_s18, 4  ;;  %s367_s0 = smov [#allocation8]   ;;  %s49_s19 = int_to_ptr.vmem [resolvable:$true] %s48_s19 }
   0xb   :  { %54 = dma.hbm_to_vmem [thread:$0]  %s47_s15, 2048, %s49_s19, [#allocation6], %s363_s9, %s363_s9, %s364_s10  }
   0xc   :  { %s63_s20 = sshll.u32 %s367_s0, 4  ;;  %s64_s20 = int_to_ptr.vmem [resolvable:$true] %s63_s20 }
   0xd   :  { %69 = dma.hbm_to_vmem [thread:$0]  %s62_s17, 2048, %s64_s20, [#allocation9], %s363_s9, %s363_s9, %s364_s10  }
   0xe   :  { %354 = dma.done.wait [#allocation3], 128  }
   0xf   :  { %355 = vsyncadd [#allocation3], 4294967168 }
  0x10   :  { %356 = dma.done.wait [#allocation6], 2560  }
  0x11   :  { %357 = vsyncadd [#allocation6], 4294964736 }
  0x12   :  { %358 = dma.done.wait [#allocation9], 2048  }
  0x13   :  { %359 = vsyncadd [#allocation9], 4294965248  ;;  %v92_v0 = vld [vmem:[#allocation5 + $0x18] sm:$0xff]  ;;  %v91_v1 = vld [vmem:[#allocation5 + $0x10] sm:$0xff]  ;;  %vm97_vm0 = vcmask 261120   ;;  %s368_s24 = smov [#allocation10]  }
  0x14   :  { %113 = vmatpush.msra.mxu0 %v92_v0  ;;  %v137_v2 = vld [vmem:[#allocation7 + $0x78] sm:$0xff]  ;;  %v90_v3 = vld [vmem:[#allocation5 + $0x8] sm:$0xff]  ;;  %v136_v4 = vld [vmem:[#allocation7 + $0x70] sm:$0xff]  ;;  %s209_s25 = sshll.u32 %s368_s24, 4  ;;  %s211_s28 = sshll.u32 %s440_s7, 4  ;;  %s210_s25 = int_to_ptr.vmem [resolvable:$true] %s209_s25  ;;  %s212_s28 = int_to_ptr.hbm [resolvable:$true] %s211_s28 }
  0x15   :  { %142 = vmatpush.msra.mxu1 %v137_v2  ;;  %v135_v5 = vld [vmem:[#allocation7 + $0x68] sm:$0xff]  ;;  %v89_v6 = vld [vmem:[#allocation5] sm:$0xff]  ;;  %v88_v7 = vld [vmem:[#allocation2] sm:$0xff] }
  0x16   :  { %114 = vmatpush.msra.mxu0 %v91_v1  ;;  %v134_v8 = vld [vmem:[#allocation7 + $0x60] sm:$0xff]  ;;  %v133_v9 = vld [vmem:[#allocation7 + $0x58] sm:$0xff]  ;;  %v132_v10 = vld [vmem:[#allocation7 + $0x50] sm:$0xff] }
  0x17   :  { %143 = vmatpush.msra.mxu1 %v136_v4  ;;  %v131_v11 = vld [vmem:[#allocation7 + $0x48] sm:$0xff]  ;;  %v130_v12 = vld [vmem:[#allocation7 + $0x40] sm:$0xff]  ;;  %v129_v13 = vld [vmem:[#allocation7 + $0x38] sm:$0xff] }
  0x18   :  { %115 = vmatpush.msra.mxu0 %v90_v3  ;;  %v128_v14 = vld [vmem:[#allocation7 + $0x30] sm:$0xff]  ;;  %v127_v15 = vld [vmem:[#allocation7 + $0x28] sm:$0xff]  ;;  %v126_v16 = vld [vmem:[#allocation7 + $0x20] sm:$0xff] }
  0x19   :  { %144 = vmatpush.msra.mxu1 %v135_v5  ;;  %v125_v17 = vld [vmem:[#allocation7 + $0x18] sm:$0xff]  ;;  %v124_v18 = vld [vmem:[#allocation7 + $0x10] sm:$0xff]  ;;  %v123_v19 = vld [vmem:[#allocation7 + $0x8] sm:$0xff] }
  0x1a   :  { %116 = vmatpush.msra.mxu0 %v89_v6  ;;  %v122_v20 = vld [vmem:[#allocation7] sm:$0xff]  ;;  %v178_v21 = vld [vmem:[#allocation8 + $0x78] sm:$0xff]  ;;  %v177_v22 = vld [vmem:[#allocation8 + $0x70] sm:$0xff] }
  0x1b   :  { %223 = vmatmul.msk.f32.vlgmr.msra.gmra.mxu0 %vm97_vm0, %v88_v7  ;;  %145 = vmatpush.msra.mxu1 %v134_v8  ;;  %v176_v23 = vld [vmem:[#allocation8 + $0x68] sm:$0xff]  ;;  %v175_v24 = vld [vmem:[#allocation8 + $0x60] sm:$0xff]  ;;  %v174_v25 = vld [vmem:[#allocation8 + $0x58] sm:$0xff] }
  0x1c   :  { %183 = vmatpush.msra.mxu2 %v178_v21  ;;  %v173_v26 = vld [vmem:[#allocation8 + $0x50] sm:$0xff]  ;;  %v172_v27 = vld [vmem:[#allocation8 + $0x48] sm:$0xff]  ;;  %v171_v28 = vld [vmem:[#allocation8 + $0x40] sm:$0xff] }
  0x1d   :  { %146 = vmatpush.msra.mxu1 %v133_v9  ;;  %v170_v29 = vld [vmem:[#allocation8 + $0x38] sm:$0xff]  ;;  %v169_v30 = vld [vmem:[#allocation8 + $0x30] sm:$0xff]  ;;  %v168_v31 = vld [vmem:[#allocation8 + $0x28] sm:$0xff] }
  0x1e   :  { %184 = vmatpush.msra.mxu2 %v177_v22  ;;  %v167_v32 = vld [vmem:[#allocation8 + $0x20] sm:$0xff]  ;;  %v166_v33 = vld [vmem:[#allocation8 + $0x18] sm:$0xff]  ;;  %v165_v38 = vld [vmem:[#allocation8 + $0x10] sm:$0xff] }
  0x1f   :  { %147 = vmatpush.msra.mxu1 %v132_v10  ;;  %v231_v34 = vld [vmem:[%s435_s2] ss:$0 sm:$0xff]  ;;  %v164_v39 = vld [vmem:[#allocation8 + $0x8] sm:$0xff]  ;;  %v163_v40 = vld [vmem:[#allocation8] sm:$0xff] }
  0x20   :  { %185 = vmatpush.msra.mxu2 %v176_v23  ;;  %v232_v41 = vld [vmem:[%s437_s4] ss:$0 sm:$0xff] }
  0x21   :  { %148 = vmatpush.msra.mxu1 %v131_v11  ;;  %v233_v45 = vld [vmem:[%s439_s6] ss:$0 sm:$0xff] }
  0x22   :  { %186 = vmatpush.msra.mxu2 %v175_v24 }
  0x23   :  { %149 = vmatpush.msra.mxu1 %v130_v12 }
  0x24   :  { %187 = vmatpush.msra.mxu2 %v174_v25 }
  0x25   :  { %150 = vmatpush.msra.mxu1 %v129_v13 }
  0x26   :  { %188 = vmatpush.msra.mxu2 %v173_v26 }
  0x27   :  { %151 = vmatpush.msra.mxu1 %v128_v14 }
  0x28   :  { %189 = vmatpush.msra.mxu2 %v172_v27 }
  0x29   :  { %152 = vmatpush.msra.mxu1 %v127_v15 }
  0x2a   :  { %190 = vmatpush.msra.mxu2 %v171_v28 }
  0x2b   :  { %153 = vmatpush.msra.mxu1 %v126_v16 }
  0x2c   :  { %191 = vmatpush.msra.mxu2 %v170_v29 }
  0x2d   :  { %154 = vmatpush.msra.mxu1 %v125_v17 }
  0x2e   :  { %192 = vmatpush.msra.mxu2 %v169_v30 }
  0x2f   :  { %155 = vmatpush.msra.mxu1 %v124_v18 }
  0x30   :  { %193 = vmatpush.msra.mxu2 %v168_v31 }
  0x31   :  { %156 = vmatpush.msra.mxu1 %v123_v19 }
  0x32   :  { %194 = vmatpush.msra.mxu2 %v167_v32 }
  0x33   :  { %157 = vmatpush.msra.mxu1 %v122_v20 }
  0x34   :  { %195 = vmatpush.msra.mxu2 %v166_v33 }
  0x36   :  { %196 = vmatpush.msra.mxu2 %v165_v38 }
  0x38   :  { %197 = vmatpush.msra.mxu2 %v164_v39 }
  0x3a   :  { %198 = vmatpush.msra.mxu2 %v163_v40 }
  0x98   :  { %v118_v35 = vpop.f32.mrf.mxu0 }
  0x99   :  { %v119_v36 = vadd.f32 %v231_v34, %v118_v35 }
  0x9b   :  { %v121_v37 = vmax.f32 %v119_v36, 0.0 }
  0x9d   :  { %158 = vmatmul.f32.vlgmr.msra.gmra.mxu1 %v121_v37 }
 0x11a   :  { %v159_v42 = vpop.f32.mrf.mxu1 }
 0x11b   :  { %v160_v43 = vadd.f32 %v232_v41, %v159_v42 }
 0x11d   :  { %v162_v44 = vmax.f32 %v160_v43, 0.0 }
 0x11f   :  { %199 = vmatmul.f32.vlgmr.msra.gmra.mxu2 %v162_v44 }
 0x1a2   :  { %v200_v46 = vpop.f32.mrf.mxu2 }
 0x1a3   :  { %v201_v47 = vadd.f32 %v233_v45, %v200_v46 }
 0x1a5   :  { %203 = vst [vmem:[#allocation10] sm:$0xff] %v201_v47 }
 0x1a6   :  { %214 = dma.vmem_to_hbm [thread:$0]  %s210_s25, 128, %s212_s28, [#allocation4]  }
 0x1a7   :  { %360 = dma.done.wait [#allocation4], 128  }
 0x1a8   :  { %361 = vsyncadd [#allocation4], 4294967168 }
 0x1a9   :  { %219 = vsyncpa [#allocation3], 1 }
 0x1aa   :  { %220 = vsyncpa [#allocation6], 1 }
 0x1ab   :  { %221 = vsyncpa [#allocation9], 1 }
 0x1ac   :  { %222 = vsyncpa [#allocation4], 1 }

</bundles_post_ra>
